<compile_context>
chip_gen: v6e
topology: v6e:2x2x1
jax: 0.10.0
libtpu: 0.0.40
codegen_flags: <defaults>
</compile_context>

<pallas_src>
import functools
import math

import jax
import jax.numpy as jnp
from jax.experimental import pallas as pl
from jax.experimental.pallas import tpu as pltpu


# ---------------------------------------------------------------------------
# Kernel 1: core decompression (basis_weights @ basis) with fused
#           rank-adapter activation + scaling.  Single full-extent block,
#           no grid scaffolding (these operands are small).
# ---------------------------------------------------------------------------

def _decompress_cores_kernel(bw_ref, basis_ref, adapt_ref, expand_ref, out_ref,
                             *, activation):
    # cores[m, r1*(M*R) + i*R + r2] = sum_b bw[m, b] * basis[b, r1, i, r2]
    cores = jnp.dot(bw_ref[...], basis_ref[...],
                    preferred_element_type=jnp.float32)            # (nm, R*M*R)
    adapters = adapt_ref[...]                                      # (nm, R)
    if activation == "exp":                                        # static branch
        adapters = jnp.exp(adapters)                               # EUP, fused
    # expand_ref[r, r*(M*R) + j] = 1  =>  scale[m, c] = act(adapters)[m, c // (M*R)]
    # (tiny MXU matmul; avoids in-kernel reshape / gather for the broadcast).
    scale = jnp.dot(adapters, expand_ref[...],
                    preferred_element_type=jnp.float32)            # (nm, R*M*R)
    out_ref[...] = cores * scale


def _decompress_cores_kernel_noadapt(bw_ref, basis_ref, out_ref):
    out_ref[...] = jnp.dot(bw_ref[...], basis_ref[...],
                           preferred_element_type=jnp.float32)


def decompress_cores(basis_weights, basis, rank_adapters, activation):
    """basis_weights: (num_modes, num_basis); basis: (num_basis, R, M, R);
    rank_adapters: (num_modes, R) pre-activation parameters, or None.
    Returns cores: (num_modes, R, M, R) float32."""
    num_modes, num_basis = basis_weights.shape
    nb, r, m, r2 = basis.shape
    assert nb == num_basis and r == r2
    rmr = r * m * r
    basis_flat = basis.reshape(num_basis, rmr)

    vmem = pl.BlockSpec(memory_space=pltpu.MemorySpace.VMEM)
    if rank_adapters is None:
        cores_flat = pl.pallas_call(
            _decompress_cores_kernel_noadapt,
            out_shape=jax.ShapeDtypeStruct((num_modes, rmr), jnp.float32),
            in_specs=[vmem, vmem],
            out_specs=vmem,
        )(basis_weights, basis_flat)
    else:
        expand = jnp.repeat(jnp.eye(r, dtype=jnp.float32), m * r, axis=1)
        cores_flat = pl.pallas_call(
            functools.partial(_decompress_cores_kernel, activation=activation),
            out_shape=jax.ShapeDtypeStruct((num_modes, rmr), jnp.float32),
            in_specs=[vmem, vmem, vmem, vmem],
            out_specs=vmem,
        )(basis_weights, basis_flat, rank_adapters, expand)
    return cores_flat.reshape(num_modes, r, m, r)


# ---------------------------------------------------------------------------
# Tensor-ring contraction (JAX glue).
#   W[i1..id] = trace(G1[:, i1, :] @ G2[:, i2, :] @ ... @ Gd[:, id, :])
# A chain of (R*M^k, R) @ (R, M*R) matmuls with a reshape between each step;
# rank << 128 so there is no MXU win from a Pallas version, only launch cost.
# TODO(synk): move into a Pallas kernel if rank ever reaches MXU-friendly sizes.
# ---------------------------------------------------------------------------

def tensor_ring_contract(cores):
    num_modes, r, m, _ = cores.shape
    t = cores[0].reshape(r * m, r)                 # rows (r0, i1), cols r1
    for k in range(1, num_modes):
        g = cores[k].reshape(r, m * r)             # rows r_{k-1}, cols (ik, rk)
        t = jnp.dot(t, g)                          # rows (r0, i1..i_{k-1}), cols (ik, rk)
        t = t.reshape(-1, r)                       # rows (r0, i1..ik), cols rk
    t = t.reshape(r, m ** num_modes, r)
    # close the ring: W[i] = sum_r t[r, i, r]
    w = jnp.sum(t * jnp.eye(r, dtype=t.dtype)[:, None, :], axis=(0, 2))
    return w.reshape((m,) * num_modes)


# ---------------------------------------------------------------------------
# Kernel 2: y = x @ W.T + bias (tiled MXU matmul, bias fused in epilogue)
# ---------------------------------------------------------------------------

def _linear_bias_kernel(x_ref, w_ref, b_ref, o_ref, acc_ref):
    @pl.when(pl.program_id(2) == 0)
    def _():
        acc_ref[...] = jnp.zeros_like(acc_ref)
    acc_ref[...] += jnp.dot(x_ref[...], w_ref[...],
                            preferred_element_type=jnp.float32)
    @pl.when(pl.program_id(2) == pl.num_programs(2) - 1)
    def _():
        o_ref[...] = (acc_ref[...] + b_ref[...]).astype(o_ref.dtype)


def _linear_nobias_kernel(x_ref, w_ref, o_ref, acc_ref):
    @pl.when(pl.program_id(2) == 0)
    def _():
        acc_ref[...] = jnp.zeros_like(acc_ref)
    acc_ref[...] += jnp.dot(x_ref[...], w_ref[...],
                            preferred_element_type=jnp.float32)
    @pl.when(pl.program_id(2) == pl.num_programs(2) - 1)
    def _():
        o_ref[...] = acc_ref[...].astype(o_ref.dtype)


def _pick_tile(dim, preferred):
    # Use the preferred MXU-friendly tile when it divides the dim, otherwise
    # fall back to a single full-extent block along that axis (valid per the
    # "(8,128) or full-dim" rule; fine for the small shapes used here).
    return preferred if dim % preferred == 0 else dim


def linear_forward(x, weight, bias):
    """y = x @ weight.T + bias.  x: (B, in), weight: (out, in), bias: (out,)|None."""
    b_dim, in_dim = x.shape
    out_dim, in_dim2 = weight.shape
    assert in_dim == in_dim2
    wt = weight.T                                   # (in, out): lane-dense output cols
    tm = _pick_tile(b_dim, 128)
    tn = _pick_tile(out_dim, 128)
    tk = _pick_tile(in_dim, 256)
    grid = (b_dim // tm, out_dim // tn, in_dim // tk)

    x_spec = pl.BlockSpec((tm, tk), lambda i, j, k: (i, k))
    w_spec = pl.BlockSpec((tk, tn), lambda i, j, k: (k, j))
    o_spec = pl.BlockSpec((tm, tn), lambda i, j, k: (i, j))
    scratch = [pltpu.VMEM((tm, tn), jnp.float32)]
    cparams = pltpu.CompilerParams(
        dimension_semantics=("parallel", "parallel", "arbitrary"))

    if bias is None:
        return pl.pallas_call(
            _linear_nobias_kernel,
            out_shape=jax.ShapeDtypeStruct((b_dim, out_dim), x.dtype),
            grid_spec=pltpu.PrefetchScalarGridSpec(
                num_scalar_prefetch=0, grid=grid,
                in_specs=[x_spec, w_spec], out_specs=o_spec,
                scratch_shapes=scratch),
            compiler_params=cparams,
        )(x, wt)

    bias2d = bias.reshape(1, out_dim)
    b_spec = pl.BlockSpec((1, tn), lambda i, j, k: (0, j))
    return pl.pallas_call(
        _linear_bias_kernel,
        out_shape=jax.ShapeDtypeStruct((b_dim, out_dim), x.dtype),
        grid_spec=pltpu.PrefetchScalarGridSpec(
            num_scalar_prefetch=0, grid=grid,
            in_specs=[x_spec, w_spec, b_spec], out_specs=o_spec,
            scratch_shapes=scratch),
        compiler_params=cparams,
    )(x, wt, bias2d)


# ---------------------------------------------------------------------------
# Modules (parameter containers / glue)
# ---------------------------------------------------------------------------

class RankAdaptationModule:
    """JAX port of RankAdaptationModule.  The activation is NOT a standalone
    Pallas kernel: 'linear' returns the parameter as-is and 'exp' is fused
    into the core-decompression kernel (see _decompress_cores_kernel)."""

    def __init__(self, num_modes, rank, activation):
        assert num_modes > 0
        assert activation in ("linear", "exp")
        self.num_modes = num_modes
        self.rank = rank
        self.activation = activation
        self._num_parameters = num_modes * rank
        self.rank_adapters = None
        self.initialize_identity()

    @staticmethod
    def _act_fwd(x, activation):
        return {"linear": lambda a: a, "exp": jnp.exp}[activation](x)

    @staticmethod
    def _act_inv(x, activation):
        return {"linear": lambda a: a, "exp": jnp.log}[activation](x)

    def initialize_const(self, c):
        init = jnp.full((self.num_modes, self.rank), c, dtype=jnp.float32)
        self.rank_adapters = self._act_inv(init, self.activation)

    def initialize_identity(self):
        self.initialize_const(1.0)

    def num_parameters(self):
        return self._num_parameters

    def forward(self):
        # Standalone path kept only for API parity (tiny op, no Pallas launch).
        if self.activation == "linear":
            return self.rank_adapters
        return jnp.exp(self.rank_adapters)

    __call__ = forward


class TBasisLinear:
    """Self-contained JAX/Pallas port of TBasisLinear (tensor-ring parameterized
    nn.Linear).  Holds its own basis (no shared basis module / external proxy)
    and requires out_features / in_features to be exact powers of `mode`.
    # TODO(synk): compute_pad_to_powers_plan / compute_z_order permutation
    # helpers from the original repo are not reproduced; an identity
    # (power-of-mode, non-permuted) factorization plan is used instead.
    """

    def __init__(self, in_features, out_features, *, mode, rank, num_basis,
                 rank_adaptation=None, bias=True, key=None):
        assert rank_adaptation in (None, "linear", "exp")
        self.in_features = in_features
        self.out_features = out_features
        self.mode = mode
        self.rank = rank
        self.num_basis = num_basis
        self.rank_adaptation = rank_adaptation

        d_out = int(round(math.log(out_features, mode)))
        d_in = int(round(math.log(in_features, mode)))
        assert mode ** d_out == out_features and mode ** d_in == in_features, \
            "out/in features must be exact powers of `mode` (padding plan not implemented)"
        self.num_modes = d_out + d_in

        if key is None:
            key = jax.random.PRNGKey(0)
        k_basis, k_bw, k_bias = jax.random.split(key, 3)
        # Stand-in for basis_module.last_basis, shape (num_basis, R, M, R).
        self.basis = jax.random.normal(
            k_basis, (num_basis, rank, mode, rank), dtype=jnp.float32)
        # basis_weights ~ N(0,1) clamped to [-3, 3], as in the reference.
        self.basis_weights = jnp.clip(
            jax.random.normal(k_bw, (self.num_modes, num_basis), dtype=jnp.float32),
            -3.0, 3.0)
        if rank_adaptation is not None:
            self.rank_adapters = RankAdaptationModule(self.num_modes, rank,
                                                      rank_adaptation)
        else:
            self.rank_adapters = None
        self.bias = (0.01 * jax.random.normal(k_bias, (out_features,),
                                              dtype=jnp.float32)
                     if bias else None)
        self._initialize_std_correction()

    def _initialize_std_correction(self, gain=math.sqrt(2.0)):
        # Mirrors TBasisLayerBase.initialize: scale basis_weights so the
        # decompressed weight hits the kaiming fan_in std target.
        std_target = gain / math.sqrt(self.in_features)
        std_before = float(jnp.std(self.decompress_full()))
        core_scaler = (std_target / std_before) ** (1.0 / self.num_modes)
        self.basis_weights = self.basis_weights * core_scaler

    def decompress_full(self):
        adapters = (None if self.rank_adapters is None
                    else self.rank_adapters.rank_adapters)
        activation = "linear" if self.rank_adaptation is None else self.rank_adaptation
        cores = decompress_cores(self.basis_weights, self.basis, adapters, activation)
        w = tensor_ring_contract(cores)                       # (mode,) * num_modes
        return w.reshape(self.out_features, self.in_features)

    def forward(self, x):
        weight = self.decompress_full()
        return linear_forward(x, weight, self.bias)

    __call__ = forward

    def num_parameters(self):
        n = self.num_modes * self.num_basis
        if self.rank_adapters is not None:
            n += self.rank_adapters.num_parameters()
        return n


# ---------------------------------------------------------------------------
# Pure-JAX reference for correctness checking
# ---------------------------------------------------------------------------

def _reference_forward(layer, x):
    r, m = layer.rank, layer.mode
    cores = jnp.dot(layer.basis_weights,
                    layer.basis.reshape(layer.num_basis, -1))
    cores = cores.reshape(layer.num_modes, r, m, r)
    if layer.rank_adapters is not None:
        a = RankAdaptationModule._act_fwd(layer.rank_adapters.rank_adapters,
                                          layer.rank_adaptation)
        cores = cores * a[:, :, None, None]
    t = cores[0].reshape(r * m, r)
    for k in range(1, layer.num_modes):
        t = jnp.dot(t, cores[k].reshape(r, m * r)).reshape(-1, r)
    t = t.reshape(r, m ** layer.num_modes, r)
    w = jnp.sum(t * jnp.eye(r, dtype=t.dtype)[:, None, :], axis=(0, 2))
    w = w.reshape(layer.out_features, layer.in_features)
    y = jnp.dot(x, w.T)
    if layer.bias is not None:
        y = y + layer.bias
    return y


# ---------------------------------------------------------------------------
# Demo / correctness check
# ---------------------------------------------------------------------------

if __name__ == "__main__":
    # Make the plain-JAX glue / reference use full f32 matmuls so the
    # comparison against the f32 MXU Pallas kernels is tight.
    jax.config.update("jax_default_matmul_precision", "highest")

    key = jax.random.PRNGKey(0)
    k_mod, k_x, k_adapt = jax.random.split(key, 3)

    batch = 8
    mode, rank, num_basis = 4, 8, 16
    in_features, out_features = mode ** 3, mode ** 3      # 64, 64 -> 6 TR modes

    x = jax.random.normal(k_x, (batch, in_features), dtype=jnp.float32)

    ok = True
    for rank_adaptation in ("exp", "linear", None):
        layer = TBasisLinear(in_features, out_features, mode=mode, rank=rank,
                             num_basis=num_basis, rank_adaptation=rank_adaptation,
                             bias=True, key=k_mod)
        # Identity-initialized adapters (ones / exp(0)) must run cleanly.
        y_ident = jax.block_until_ready(layer(x))
        assert y_ident.shape == (batch, out_features)

        # Exercise the fused activation with non-trivial adapter values.
        if layer.rank_adapters is not None:
            layer.rank_adapters.rank_adapters = 0.3 * jax.random.normal(
                k_adapt, (layer.num_modes, rank), dtype=jnp.float32)

        y = jax.block_until_ready(layer(x))
        y_ref = jax.block_until_ready(_reference_forward(layer, x))
        assert y.shape == (batch, out_features) and y.dtype == jnp.float32
        err = float(jnp.max(jnp.abs(y - y_ref)))
        tol = 1e-3 * max(1.0, float(jnp.max(jnp.abs(y_ref))))
        if not (err <= tol):
            ok = False
            print(f"mismatch rank_adaptation={rank_adaptation}: "
                  f"max_abs_err={err:.3e} tol={tol:.3e}")

    if ok:
        print("KERNEL_OK")
</pallas_src>

<mosaic_0001>
module attributes {stable_mosaic.version = 11 : i64} {
  func.func @_decompress_cores_kernel(%arg0: memref<6x16xf32, #tpu.memory_space<vmem>>, %arg1: memref<16x256xf32, #tpu.memory_space<vmem>>, %arg2: memref<6x8xf32, #tpu.memory_space<vmem>>, %arg3: memref<8x256xf32, #tpu.memory_space<vmem>>, %arg4: memref<6x256xf32, #tpu.memory_space<vmem>>) attributes {dimension_semantics = [], scalar_prefetch = 0 : i64, scratch_operands = 0 : i64, tpu.core_type = #tpu.core_type<tc>} {
    %c0 = arith.constant 0 : index
    %c0_0 = arith.constant 0 : index
    %0 = vector.load %arg0[%c0, %c0_0] : memref<6x16xf32, #tpu.memory_space<vmem>>, vector<6x16xf32>
    %c0_1 = arith.constant 0 : index
    %c0_2 = arith.constant 0 : index
    %1 = vector.load %arg1[%c0_1, %c0_2] : memref<16x256xf32, #tpu.memory_space<vmem>>, vector<16x256xf32>
    %cst = arith.constant dense<0.000000e+00> : vector<6x256xf32>
    %2 = tpu.matmul %0, %1, %cst {dimension_numbers = #tpu.dot_dimension_numbers<[1], [0], [0], [1], [0, 0, 1, 1], [], []>, precision = #tpu.contract_precision<fp32>} : vector<6x16xf32>, vector<16x256xf32>, vector<6x256xf32> -> vector<6x256xf32>
    %c0_3 = arith.constant 0 : index
    %c0_4 = arith.constant 0 : index
    %3 = vector.load %arg2[%c0_3, %c0_4] : memref<6x8xf32, #tpu.memory_space<vmem>>, vector<6x8xf32>
    %4 = math.exp %3 : vector<6x8xf32>
    %c0_5 = arith.constant 0 : index
    %c0_6 = arith.constant 0 : index
    %5 = vector.load %arg3[%c0_5, %c0_6] : memref<8x256xf32, #tpu.memory_space<vmem>>, vector<8x256xf32>
    %cst_7 = arith.constant dense<0.000000e+00> : vector<6x256xf32>
    %6 = tpu.matmul %4, %5, %cst_7 {dimension_numbers = #tpu.dot_dimension_numbers<[1], [0], [0], [1], [0, 0, 1, 1], [], []>, precision = #tpu.contract_precision<fp32>} : vector<6x8xf32>, vector<8x256xf32>, vector<6x256xf32> -> vector<6x256xf32>
    %7 = arith.mulf %2, %6 : vector<6x256xf32>
    %c0_8 = arith.constant 0 : index
    %c0_9 = arith.constant 0 : index
    %8 = vector.load %arg4[%c0_8, %c0_9] : memref<6x256xf32, #tpu.memory_space<vmem>>, vector<6x256xf32>
    tpu.vector_store %arg4[%c0_8, %c0_9], %7 {strides = array<i32>} : memref<6x256xf32, #tpu.memory_space<vmem>>, vector<6x256xf32>,
    return
  }
}

</mosaic_0001>

<bundles_post_ra>
// kernel: tpu_custom_call.1
= control target key start
LH: loop header
LB: loop body
LE: loop exit
PB: predicated region body
PF: predicated region fallthrough
CT: control target
= control target key end

     0   :  { %9 = vsyncpa [#allocation3], 0  ;;  %s1282_s0 = inlined_call_operand.hbm [shape: f32[6,16], index: 0, kind: input, shape index: {}]   ;;  %s1283_s1 = inlined_call_operand.hbm [shape: f32[16,256], index: 1, kind: input, shape index: {}]   ;;  %s1284_s2 = inlined_call_operand.hbm [shape: f32[6,8], index: 2, kind: input, shape index: {}]   ;;  %s1285_s3 = inlined_call_operand.hbm [shape: f32[8,256], index: 3, kind: input, shape index: {}]   ;;  %s1286_s4 = inlined_call_operand.hbm [shape: f32[6,256], index: 4, kind: output, shape index: {}]  }
   0x1   :  { %10 = vsyncpa [#allocation6], 0 }
   0x2   :  { %11 = vsyncpa [#allocation9], 0 }
   0x3   :  { %12 = vsyncpa [#allocation4], 0  ;;  %s1180_s15 = smov [#allocation5]  }
   0x4   :  { %s28_s16 = sshll.u32 %s1180_s15, 4  ;;  %s29_s16 = int_to_ptr.vmem [resolvable:$true] %s28_s16 }
   0x5   :  { %s1080_s17 = scalar_lea.vmem %s29_s16, 512  ;;  %p1085_p1 = scmp.lt.s32.totalorder %s29_s16, %s29_s16 }
   0x6   :  { %p1081_p0 = scmp.ne.s32.totalorder %s29_s16, %s1080_s17  ;;  %p1086_p2 = scmp.lt.s32.totalorder %s1080_s17, %s1080_s17 }
   0x8   :  { %p1087_p3 = por %p1086_p2, %p1085_p1 }
   0xa   :  { %p1088_p4 = pnand %p1087_p3, %p1081_p0 }
   0xc   :  { %1091 = shalt.err (!%p1088_p4)
}
   0xd   :  { %s1181_s18 = smov 256   ;;  %s1182_s19 = smov 16  }
   0xe   :  { %34 = dma.hbm_to_vmem [thread:$0]  %s1283_s1, 512, %s29_s16, [#allocation6], %s1181_s18, %s1181_s18, %s1182_s19  }
   0xf   :  { %s1183_s22 = smov [#allocation2]   ;;  %s1184_s24 = smov [#allocation7]  }
  0x10   :  { %s19_s23 = sshll.u32 %s1183_s22, 4  ;;  %s41_s25 = sshll.u32 %s1184_s24, 4  ;;  %s20_s23 = int_to_ptr.vmem [resolvable:$true] %s19_s23  ;;  %s42_s25 = int_to_ptr.vmem [resolvable:$true] %s41_s25 }
  0x11   :  { %s1100_s26 = scalar_lea.vmem %s20_s23, 128  ;;  %p1105_p6 = scmp.lt.s32.totalorder %s20_s23, %s20_s23 }
  0x12   :  { %p1101_p5 = scmp.ne.s32.totalorder %s20_s23, %s1100_s26  ;;  %p1106_p7 = scmp.lt.s32.totalorder %s1100_s26, %s1100_s26 }
  0x14   :  { %p1107_p8 = por %p1106_p7, %p1105_p6 }
  0x16   :  { %p1108_p9 = pnand %p1107_p8, %p1101_p5 }
  0x18   :  { %1111 = shalt.err (!%p1108_p9)
}
  0x19   :  { %22 = dma.hbm_to_vmem [thread:$0]  %s1282_s0, 128, %s20_s23, [#allocation3]  }
  0x1a   :  { %s1120_s29 = scalar_lea.vmem %s42_s25, 128  ;;  %p1125_p11 = scmp.lt.s32.totalorder %s42_s25, %s42_s25 }
  0x1b   :  { %p1121_p10 = scmp.ne.s32.totalorder %s42_s25, %s1120_s29  ;;  %p1126_p12 = scmp.lt.s32.totalorder %s1120_s29, %s1120_s29 }
  0x1d   :  { %p1127_p13 = por %p1126_p12, %p1125_p11 }
  0x1f   :  { %p1128_p0 = pnand %p1127_p13, %p1121_p10 }
  0x21   :  { %1131 = shalt.err (!%p1128_p0)
}
  0x22   :  { %44 = dma.hbm_to_vmem [thread:$0]  %s1284_s2, 128, %s42_s25, [#allocation6]  }
  0x23   :  { %s1185_s5 = smov [#allocation8]  }
  0x24   :  { %s51_s6 = sshll.u32 %s1185_s5, 4  ;;  %s52_s6 = int_to_ptr.vmem [resolvable:$true] %s51_s6 }
  0x25   :  { %s1140_s7 = scalar_lea.vmem %s52_s6, 256  ;;  %p1145_p2 = scmp.lt.s32.totalorder %s52_s6, %s52_s6 }
  0x26   :  { %p1141_p1 = scmp.ne.s32.totalorder %s52_s6, %s1140_s7  ;;  %p1146_p3 = scmp.lt.s32.totalorder %s1140_s7, %s1140_s7 }
  0x28   :  { %p1147_p4 = por %p1146_p3, %p1145_p2 }
  0x2a   :  { %p1148_p5 = pnand %p1147_p4, %p1141_p1 }
  0x2c   :  { %1151 = shalt.err (!%p1148_p5)
}
  0x2d   :  { %54 = dma.hbm_to_vmem [thread:$0]  %s1285_s3, 256, %s52_s6, [#allocation9]  }
  0x2e   :  { %1172 = dma.done.wait [#allocation3], 128  }
  0x2f   :  { %1173 = vsyncadd [#allocation3], 4294967168 }
  0x30   :  { %1174 = dma.done.wait [#allocation6], 640  }
  0x31   :  { %1175 = vsyncadd [#allocation6], 4294966656 }
  0x32   :  { %1176 = dma.done.wait [#allocation9], 256  }
  0x33   :  { %1177 = vsyncadd [#allocation9], 4294967040  ;;  %v1186_v0 = vmov 0.0   ;;  %vm72_vm0 = vcmask 130048   ;;  %v71_v1 = vld [vmem:[#allocation5 + $0x18] sm:$0xff]  ;;  %v70_v2 = vld [vmem:[#allocation5 + $0x10] sm:$0xff] }
  0x34   :  { %144 = vmatprep.mubr.f32.mxu0 %v1186_v0  ;;  %240 = vmatprep.mubr.f32.mxu1 %v1186_v0  ;;  %v69_v3 = vld [vmem:[#allocation5 + $0x8] sm:$0xff]  ;;  %v1227_v4 = vand.u32 4294901760, %v71_v1  ;;  %v1229_v5 = vand.u32 4294901760, %v70_v2  ;;  %v68_v7 = vld [vmem:[#allocation5] sm:$0xff]  ;;  %v67_v8 = vld [vmem:[#allocation2] sm:$0x3f] }
  0x35   :  { %v1231_v6 = vand.u32 4294901760, %v69_v3  ;;  %v1233_v9 = vand.u32 4294901760, %v68_v7  ;;  %v74_v10 = vsel %vm72_vm0, %v67_v8, 0  ;;  %v567_v11 = vld [vmem:[#allocation7] sm:$0x3f]  ;;  %v571_v16 = vld [vmem:[#allocation8 + $0x8] sm:$0xff] }
  0x36   :  { %105 = vmatprep.subr.mxu0 %v1227_v4  ;;  %v185_v12 = vsub.f32 %v71_v1, %v1227_v4  ;;  %v191_v13 = vsub.f32 %v70_v2, %v1229_v5  ;;  %v1238_v14 = vand.u32 4294901760, %v74_v10  ;;  %v568_v18 = vmul.f32 1.442695, %v567_v11  ;;  %v570_v23 = vld [vmem:[#allocation8] sm:$0xff]  ;;  %s1187_s2 = smov [#allocation10]  }
  0x37   :  { %v197_v15 = vsub.f32 %v69_v3, %v1231_v6  ;;  %107 = vmatpush1.msra.mxu0 %v1229_v5  ;;  %v203_v17 = vsub.f32 %v68_v7, %v1233_v9  ;;  %v1246_v25 = vand.u32 4294901760, %v571_v16  ;;  %v1248_v31 = vand.u32 4294901760, %v570_v23  ;;  %s1051_s3 = sshll.u32 %s1187_s2, 4  ;;  %s1052_s3 = int_to_ptr.vmem [resolvable:$true] %s1051_s3 }
  0x38   :  { %109 = vmatprep.subr.mxu0 %v1231_v6  ;;  %v186_v19 = vand.u32 4294901760, %v185_v12  ;;  %v192_v20 = vand.u32 4294901760, %v191_v13  ;;  %v146_v21 = vsub.f32 %v74_v10, %v1238_v14  ;;  %1070 = vpow2.f32 %v568_v18  ;;  %s1152_s9 = scalar_lea.vmem %s1052_s3, 256  ;;  %p1157_p7 = scmp.lt.s32.totalorder %s1052_s3, %s1052_s3 }
  0x39   :  { %v198_v22 = vand.u32 4294901760, %v197_v15  ;;  %111 = vmatpush1.msra.mxu0 %v1233_v9  ;;  %v204_v24 = vand.u32 4294901760, %v203_v17  ;;  %v685_v38 = vsub.f32 %v571_v16, %v1246_v25  ;;  %v691_v39 = vsub.f32 %v570_v23, %v1248_v31  ;;  %p1153_p6 = scmp.ne.s32.totalorder %s1052_s3, %s1152_s9  ;;  %p1158_p8 = scmp.lt.s32.totalorder %s1152_s9, %s1152_s9 }
  0x3a   :  { %v187_v26 = vsub.f32 %v185_v12, %v186_v19  ;;  %v193_v27 = vsub.f32 %v191_v13, %v192_v20  ;;  %v147_v28 = vand.u32 4294901760, %v146_v21  ;;  %278 = vmatprep.subr.mxu0 %v185_v12  ;;  %vm572_vm1 = vcmask 64512  }
  0x3b   :  { %v199_v29 = vsub.f32 %v197_v15, %v198_v22  ;;  %v205_v30 = vsub.f32 %v203_v17, %v204_v24  ;;  %v686_v40 = vand.u32 4294901760, %v685_v38  ;;  %v692_v41 = vand.u32 4294901760, %v691_v39  ;;  %p1159_p9 = por %p1158_p8, %p1157_p7 }
  0x3c   :  { %v188_v32 = vand.u32 4294901760, %v187_v26  ;;  %v194_v33 = vand.u32 4294901760, %v193_v27  ;;  %v148_v34 = vsub.f32 %v146_v21, %v147_v28 }
  0x3d   :  { %v200_v35 = vand.u32 4294901760, %v199_v29  ;;  %v206_v36 = vand.u32 4294901760, %v205_v30  ;;  %v687_v43 = vsub.f32 %v685_v38, %v686_v40  ;;  %v693_v44 = vsub.f32 %v691_v39, %v692_v41  ;;  %p1160_p10 = pnand %p1159_p9, %p1153_p6 }
  0x3e   :  { %189 = vmatprep.subr.mxu1 %v188_v32  ;;  %v149_v37 = vand.u32 4294901760, %v148_v34 }
  0x3f   :  { %195 = vmatpush1.msra.mxu1 %v194_v33  ;;  %v688_v47 = vand.u32 4294901760, %v687_v43  ;;  %v694_v49 = vand.u32 4294901760, %v693_v44 }
  0x40   :  { %150 = vmatmul.mubr.f32.vlgmr.msra.gmra.mxu0 %v149_v37  ;;  %201 = vmatprep.subr.mxu1 %v200_v35 }
  0x41   :  { %207 = vmatpush1.msra.mxu1 %v206_v36  ;;  %281 = vmatpush1.msra.mxu0 %v191_v13 }
  0x42   :  { %242 = vmatmul.mubr.f32.vlgmr.msra.gmra.mxu1 %v1238_v14  ;;  %284 = vmatprep.subr.mxu0 %v197_v15 }
  0x43   :  { %358 = vmatprep.subr.mxu1 %v1227_v4  ;;  %287 = vmatpush1.msra.mxu0 %v203_v17 }
  0x44   :  { %320 = vmatprep.mubr.f32.mxu0 %v1186_v0  ;;  %360 = vmatpush1.msra.mxu1 %v1229_v5 }
  0x45   :  { %323 = vmatmul.mubr.f32.vlgmr.msra.gmra.mxu0 %v146_v21  ;;  %362 = vmatprep.subr.mxu1 %v1231_v6  ;;  %v1071_v42 = vpop.eup %1070 }
  0x46   :  { %438 = vmatprep.subr.mxu0 %v186_v19  ;;  %364 = vmatpush1.msra.mxu1 %v1233_v9  ;;  %v574_v45 = vsel %vm572_vm1, %v1071_v42, 0 }
  0x47   :  { %397 = vmatprep.mubr.f32.mxu1 %v1186_v0  ;;  %442 = vmatpush1.msra.mxu0 %v192_v20  ;;  %v643_v46 = vand.u32 4294901760, %v574_v45 }
  0x48   :  { %401 = vmatmul.mubr.f32.vlgmr.msra.gmra.mxu1 %v147_v28  ;;  %446 = vmatprep.subr.mxu0 %v198_v22 }
  0x49   :  { %520 = vmatprep.subr.mxu1 %v1227_v4  ;;  %450 = vmatpush1.msra.mxu0 %v204_v24  ;;  %v644_v48 = vsub.f32 %v574_v45, %v643_v46 }
  0x4a   :  { %483 = vmatprep.mubr.f32.mxu0 %v1186_v0  ;;  %522 = vmatpush1.msra.mxu1 %v1229_v5 }
  0x4b   :  { %485 = vmatmul.mubr.f32.vlgmr.msra.gmra.mxu0 %v1238_v14  ;;  %524 = vmatprep.subr.mxu1 %v1231_v6  ;;  %v645_v50 = vand.u32 4294901760, %v644_v48 }
  0x4c   :  { %526 = vmatpush1.msra.mxu1 %v1233_v9  ;;  %559 = vmatprep.mubr.f32.mxu1 %v1186_v0 }
  0x4d   :  { %561 = vmatmul.mubr.f32.vlgmr.msra.gmra.mxu1 %v1238_v14  ;;  %607 = vmatprep.subr.mxu0 %v1246_v25  ;;  %v646_v51 = vsub.f32 %v644_v48, %v645_v50 }
  0x4e   :  { %609 = vmatpush1.msra.mxu0 %v1248_v31  ;;  %689 = vmatprep.subr.mxu1 %v688_v47 }
  0x4f   :  { %695 = vmatpush1.msra.mxu1 %v694_v49  ;;  %642 = vmatprep.mubr.f32.mxu0 %v1186_v0  ;;  %v647_v52 = vand.u32 4294901760, %v646_v51 }
  0x50   :  { %728 = vmatprep.mubr.f32.mxu1 %v1186_v0  ;;  %768 = vmatprep.subr.mxu0 %v685_v38 }
  0x51   :  { %730 = vmatmul.mubr.f32.vlgmr.msra.gmra.mxu1 %v643_v46  ;;  %844 = vmatprep.subr.mxu1 %v1246_v25 }
  0x52   :  { %648 = vmatmul.mubr.f32.vlgmr.msra.gmra.mxu0 %v647_v52  ;;  %846 = vmatpush1.msra.mxu1 %v1248_v31 }
  0x53   :  { %771 = vmatpush1.msra.mxu0 %v691_v39  ;;  %804 = vmatprep.mubr.f32.mxu0 %v1186_v0 }
  0x54   :  { %879 = vmatprep.mubr.f32.mxu1 %v1186_v0  ;;  %922 = vmatprep.subr.mxu0 %v686_v40 }
  0x55   :  { %883 = vmatmul.mubr.f32.vlgmr.msra.gmra.mxu1 %v645_v50  ;;  %998 = vmatprep.subr.mxu1 %v1246_v25 }
  0x56   :  { %807 = vmatmul.mubr.f32.vlgmr.msra.gmra.mxu0 %v644_v48  ;;  %1000 = vmatpush1.msra.mxu1 %v1248_v31 }
  0x57   :  { %926 = vmatpush1.msra.mxu0 %v692_v41  ;;  %959 = vmatprep.mubr.f32.mxu0 %v1186_v0 }
  0x58   :  { %1033 = vmatprep.mubr.f32.mxu1 %v1186_v0 }
  0x59   :  { %1035 = vmatmul.mubr.f32.vlgmr.msra.gmra.mxu1 %v643_v46 }
  0x5a   :  { %961 = vmatmul.mubr.f32.vlgmr.msra.gmra.mxu0 %v643_v46 }
 0x100   :  { %v151_v53 = vpop.f32.mrf.mxu0 }
 0x102   :  { %v153_v54 = vpop.f32.mrf.mxu0  ;;  %v243_v55 = vpop.f32.mrf.mxu1 }
 0x103   :  { %v244_v62 = vadd.f32 %v243_v55, %v151_v53 }
 0x104   :  { %v245_v56 = vpop.f32.mrf.mxu1 }
 0x105   :  { %v324_v57 = vpop.f32.mrf.mxu0  ;;  %v246_v1 = vadd.f32 %v245_v56, %v153_v54 }
 0x106   :  { %v325_v4 = vadd.f32 %v324_v57, %v244_v62 }
 0x107   :  { %v326_v58 = vpop.f32.mrf.mxu0 }
 0x108   :  { %v402_v59 = vpop.f32.mrf.mxu1  ;;  %v327_v0 = vadd.f32 %v326_v58, %v246_v1 }
 0x109   :  { %v403_v9 = vadd.f32 %v402_v59, %v325_v4 }
 0x10a   :  { %v404_v60 = vpop.f32.mrf.mxu1 }
 0x10b   :  { %v486_v61 = vpop.f32.mrf.mxu0  ;;  %v405_v13 = vadd.f32 %v404_v60, %v327_v0 }
 0x10c   :  { %v487_v18 = vadd.f32 %v486_v61, %v403_v9 }
 0x10d   :  { %v562_v63 = vpop.f32.mrf.mxu1  ;;  %v488_v3 = vpop.f32.mrf.mxu0 }
 0x10e   :  { %v489_v23 = vadd.f32 %v488_v3, %v405_v13  ;;  %v563_v27 = vadd.f32 %v562_v63, %v487_v18 }
 0x10f   :  { %v564_v2 = vpop.f32.mrf.mxu1 }
 0x110   :  { %v565_v31 = vadd.f32 %v564_v2, %v489_v23 }
 0x111   :  { %v731_v5 = vpop.f32.mrf.mxu1 }
 0x112   :  { %v649_v6 = vpop.f32.mrf.mxu0 }
 0x113   :  { %v733_v7 = vpop.f32.mrf.mxu1  ;;  %v732_v10 = vadd.f32 %v731_v5, %v649_v6 }
 0x114   :  { %v651_v8 = vpop.f32.mrf.mxu0 }
 0x115   :  { %v884_v11 = vpop.f32.mrf.mxu1  ;;  %v734_v14 = vadd.f32 %v733_v7, %v651_v8 }
 0x116   :  { %v808_v12 = vpop.f32.mrf.mxu0 }
 0x117   :  { %v809_v15 = vadd.f32 %v808_v12, %v732_v10  ;;  %v886_v16 = vpop.f32.mrf.mxu1 }
 0x118   :  { %v810_v17 = vpop.f32.mrf.mxu0 }
 0x119   :  { %v885_v19 = vadd.f32 %v884_v11, %v809_v15  ;;  %v811_v20 = vadd.f32 %v810_v17, %v734_v14  ;;  %v1036_v22 = vpop.f32.mrf.mxu1 }
 0x11a   :  { %v962_v21 = vpop.f32.mrf.mxu0 }
 0x11b   :  { %v887_v24 = vadd.f32 %v886_v16, %v811_v20  ;;  %v963_v25 = vadd.f32 %v962_v21, %v885_v19  ;;  %v1038_v30 = vpop.f32.mrf.mxu1 }
 0x11c   :  { %v964_v26 = vpop.f32.mrf.mxu0 }
 0x11d   :  { %v1037_v28 = vadd.f32 %v1036_v22, %v963_v25  ;;  %v965_v29 = vadd.f32 %v964_v26, %v887_v24 }
 0x11f   :  { %v1041_v32 = vmul.f32 %v1037_v28, %v563_v27  ;;  %v1039_v33 = vadd.f32 %v1038_v30, %v965_v29 }
 0x121   :  { %1043 = vst [vmem:[#allocation10] sm:$0x3f] %v1041_v32  ;;  %v1042_v34 = vmul.f32 %v1039_v33, %v565_v31 }
 0x123   :  { %1044 = vst [vmem:[#allocation10 + $0x8] sm:$0x3f] %v1042_v34 }
 0x124   :  { %1163 = shalt.err (!%p1160_p10)
}
 0x125   :  { %1054 = dma.vmem_to_hbm [thread:$0]  %s1052_s3, 256, %s1286_s4, [#allocation4]  }
 0x126   :  { %1178 = dma.done.wait [#allocation4], 256  }
 0x127   :  { %1179 = vsyncadd [#allocation4], 4294967040 }
 0x128   :  { %1058 = vsyncpa [#allocation3], 1 }
 0x129   :  { %1059 = vsyncpa [#allocation6], 1 }
 0x12a   :  { %1060 = vsyncpa [#allocation9], 1 }
 0x12b   :  { %1061 = vsyncpa [#allocation4], 1 }

</bundles_post_ra>
